<compile_context>
chip_gen: v5e
topology: v5e:2x2
jax: 0.10.0
libtpu: 0.0.40
codegen_flags: <defaults>
</compile_context>

<pallas_src>
import jax
import jax.numpy as jnp
from jax.experimental import pallas as pl
from jax.experimental.pallas import tpu as pltpu


# ----------------------------- helpers --------------------------------------


def _round_up(v, m):
    return ((v + m - 1) // m) * m


def _sublane_tile(itemsize):
    # native sublane tiling per element width (f32: 8, bf16/f16: 16, int8/fp8: 32)
    return {4: 8, 2: 16, 1: 32}.get(itemsize, 8)


def _vmem_limits():
    """(vmem_limit_bytes, picker_budget_bytes), generation aware (v7x: 64 MiB)."""
    try:
        info = pltpu.get_tpu_info()
        vmem_phys = int(getattr(info, "vmem_capacity_bytes", 64 << 20))
    except Exception:
        vmem_phys = 64 << 20                      # assume the smallest (v7x per-TC)
    limit = min(48 << 20, (vmem_phys * 3) // 4)   # review: cap ~40-48 MiB on v7x
    return limit, limit // 2                      # leave 2x headroom for the picker


def _pick_block_batch(N, per_sample_bytes, *, max_bt=256, vmem_budget=24 << 20):
    """Padding-aware choice of samples per grid step.

    * as large as fits the VMEM budget (cap max_bt), multiple of 8 sublanes,
    * prefers an even number of grid steps >= 2 so the parallel batch axis
      shards evenly across both TensorCores on v7x (the extra ~0.35 us step on
      single-TC v5e/v6e is negligible),
    * bt does NOT have to divide N — the wrapper pads N up to a multiple of bt.
    """
    cap = max(8, min(max_bt, int(vmem_budget // max(per_sample_bytes, 1))))
    cap = max(8, (cap // 8) * 8)
    if N <= cap:
        bt = _round_up(pl.cdiv(N, 2), 8) if N > 8 else _round_up(max(N, 1), 8)
        bt = min(bt, cap)
    else:
        steps = pl.cdiv(N, cap)
        if steps % 2:
            steps += 1                            # even #steps: no idle TC on the tail
        bt = min(_round_up(pl.cdiv(N, steps), 8), cap)
    return max(bt, 8)


# ----------------------------- kernel ---------------------------------------


def _make_trans_skeleton_kernel(C, T, V):
    VV = V * V
    inv_t = 1.0 / float(T)

    def kernel(x_ref, pdiff_ref, pcol_ref, mask_ref, o_ref):
        # x_ref:    (Bt, C*T, V)  native dtype (f32/bf16/...)
        # pdiff_ref:(V, V*V) f32  P_row - P_col   (constant, DMA'd once)
        # pcol_ref: (V, V*V) f32  P_col           (constant, DMA'd once)
        # mask_ref: (1, V*V) f32  1.0 where A_re <= 0 else 0.0
        # o_ref:    (Bt, V*V) f32 lane-dense output
        pdiff = pdiff_ref[...]

        # sq[b, i*V+j] = sum_c (mean_T x[b,c,:,i] - mean_T x[b,c,:,j])^2,
        # built directly in the flat lane-dense layout via tiny MXU matmuls.
        sq = None
        for c in range(C):                                    # static unroll, C small
            xc = x_ref[:, c * T:(c + 1) * T, :].astype(jnp.float32)   # (Bt, T, V)
            xm_c = jnp.sum(xc, axis=1) * inv_t                         # (Bt, V) mean over T
            d = jnp.dot(xm_c, pdiff,
                        preferred_element_type=jnp.float32,
                        precision=jax.lax.Precision.HIGHEST)           # (Bt, V*V)
            sq = d * d if sq is None else sq + d * d

        ed = jnp.maximum(sq, 0.0)                             # relu clamp (spec)
        max_ed = jnp.max(ed, axis=-1, keepdims=True)          # (Bt, 1) per-sample max
        ed = (max_ed - ed) * mask_ref[...]                    # complement; zero adjacency

        pcol = pcol_ref[...]
        # col[b, j] = sum_i ed[b, i*V + j]   (contract flat index with P_col)
        col = jax.lax.dot_general(ed, pcol, (((1,), (1,)), ((), ())),
                                  preferred_element_type=jnp.float32,
                                  precision=jax.lax.Precision.HIGHEST)  # (Bt, V)
        col_b = jnp.dot(col, pcol,
                        preferred_element_type=jnp.float32,
                        precision=jax.lax.Precision.HIGHEST)            # (Bt, V*V)

        # exact reciprocal: approx=True (EUP vrcp) deviates ~2^-12 > 1e-4 tolerance.
        # NOTE: col can be 0 (fully masked column) -> inf/nan, matching torch.div.
        o_ref[...] = (ed * pl.reciprocal(col_b)).astype(o_ref.dtype)

    return kernel


# ----------------------------- wrapper ---------------------------------------


def trans_skeleton(x, A, *, max_block_batch=256):
    N, C, T, V = x.shape
    VV = V * V

    # ---- constants built once in plain JAX (outside the kernel) ----
    A_re = jnp.sum(A[:3], axis=0)
    mask = (A_re <= 0).astype(jnp.float32).reshape(1, VV)     # ed*mask == where(A_re>0,0,ed)
    r = jnp.arange(V, dtype=jnp.int32)[:, None]
    l = jnp.arange(VV, dtype=jnp.int32)[None, :]
    p_row = (l // V == r).astype(jnp.float32)                 # (V, V*V)
    p_col = (l % V == r).astype(jnp.float32)                  # (V, V*V)
    p_diff = p_row - p_col

    # ---- padding-aware per-sample VMEM accounting ----
    lane_v = _round_up(V, 128)
    lane_vv = _round_up(VV, 128)
    in_bytes = _round_up(C * T, _sublane_tile(x.dtype.itemsize)) * lane_v * x.dtype.itemsize
    out_bytes = lane_vv * 4
    f32_live = 2 * _round_up(T, 8) * lane_v * 4               # per-channel upcast slab
    tmp_live = 6 * lane_vv * 4                                # d/sq/ed/col_b/out + slack
    per_sample = 2 * in_bytes + 2 * out_bytes + f32_live + tmp_live

    vmem_limit, vmem_budget = _vmem_limits()
    bt = _pick_block_batch(N, per_sample, max_bt=max_block_batch, vmem_budget=vmem_budget)

    # ---- pad N to a multiple of bt (no divisor requirement) ----
    n_pad = _round_up(N, bt)
    x3 = x.reshape(N, C * T, V)                               # free view; native dtype DMA
    if n_pad != N:
        x3 = jnp.pad(x3, ((0, n_pad - N), (0, 0), (0, 0)))

    kernel = _make_trans_skeleton_kernel(C, T, V)

    out_flat = pl.pallas_call(
        kernel,
        out_shape=jax.ShapeDtypeStruct((n_pad, VV), jnp.float32),
        grid=(n_pad // bt,),
        in_specs=[
            pl.BlockSpec((bt, C * T, V), lambda n: (n, 0, 0)),   # x, native dtype
            pl.BlockSpec((V, VV), lambda n: (0, 0)),             # P_diff (fetched once)
            pl.BlockSpec((V, VV), lambda n: (0, 0)),             # P_col  (fetched once)
            pl.BlockSpec((1, VV), lambda n: (0, 0)),             # mask   (fetched once)
        ],
        out_specs=pl.BlockSpec((bt, VV), lambda n: (n, 0)),      # lane-dense output
        compiler_params=pltpu.CompilerParams(
            dimension_semantics=("parallel",),
            vmem_limit_bytes=vmem_limit),
    )(x3, p_diff, p_col, mask)

    return out_flat[:N].reshape(N, V, V)


# ----------------------------- reference -------------------------------------


def trans_skeleton_reference(x, A):
    # Pure-JAX mirror of the PyTorch forward, for correctness checking.
    N, C, T, V = x.shape
    xm = jnp.mean(jnp.transpose(x.astype(jnp.float32), (0, 2, 3, 1)), axis=1)  # (N, V, C)
    vp = jnp.einsum('nvc,nwc->nvw', xm, xm, precision=jax.lax.Precision.HIGHEST)
    ss = jnp.sum(xm * xm, axis=2)                             # (N, V)
    sq_ed = ss[:, :, None] + ss[:, None, :] - 2.0 * vp
    ed = jnp.where(sq_ed > 0, sq_ed, 0.0)
    max_ed = jnp.max(ed.reshape(N, -1), axis=1).reshape(N, 1, 1)
    ed = max_ed - ed
    A_re = jnp.sum(A[:3], axis=0)
    ed = jnp.where(A_re > 0, 0.0, ed)
    col = jnp.sum(ed, axis=1, keepdims=True)                  # (N, 1, V)
    return ed / col


if __name__ == "__main__":
    key = jax.random.PRNGKey(0)
    N, C, T, V = 16, 4, 8, 16                                  # 2 grid steps with bt=8

    x = jax.random.normal(key, (N, C, T, V), dtype=jnp.float32)

    # Deterministic adjacency stack (identity, forward, backward links) so A_re is sparse.
    A = jnp.zeros((3, V, V), dtype=jnp.float32)
    A = A.at[0].set(jnp.eye(V, dtype=jnp.float32))
    A = A.at[1].set(jnp.eye(V, k=1, dtype=jnp.float32))
    A = A.at[2].set(jnp.eye(V, k=-1, dtype=jnp.float32))

    out = trans_skeleton(x, A)
    out = jax.block_until_ready(out)

    ref = trans_skeleton_reference(x, A)
    assert out.shape == (N, V, V)
    assert jnp.allclose(out, ref, atol=1e-4, rtol=1e-4), "mismatch vs reference"

    print("KERNEL_OK")
</pallas_src>

<mosaic_0001>
module attributes {stable_mosaic.version = 11 : i64} {
  func.func @kernel(%arg0: i32, %arg1: memref<8x32x16xf32, #tpu.memory_space<vmem>>, %arg2: memref<16x256xf32, #tpu.memory_space<vmem>>, %arg3: memref<16x256xf32, #tpu.memory_space<vmem>>, %arg4: memref<1x256xf32, #tpu.memory_space<vmem>>, %arg5: memref<8x256xf32, #tpu.memory_space<vmem>>) attributes {dimension_semantics = [#tpu.dimension_semantics<parallel>], iteration_bounds = array<i64: 2>, scalar_prefetch = 0 : i64, scratch_operands = 0 : i64, tpu.core_type = #tpu.core_type<tc>, window_params = [{transform_indices = @transform_0, window_bounds = array<i64: 8, 32, 16>}, {pipeline_mode = #tpu.pipeline_mode<synchronous>, transform_indices = @transform_1, window_bounds = array<i64: 16, 256>}, {pipeline_mode = #tpu.pipeline_mode<synchronous>, transform_indices = @transform_2, window_bounds = array<i64: 16, 256>}, {pipeline_mode = #tpu.pipeline_mode<synchronous>, transform_indices = @transform_3, window_bounds = array<i64: 1, 256>}, {transform_indices = @transform_4, window_bounds = array<i64: 8, 256>}]} {
    %c0 = arith.constant 0 : index
    %c0_0 = arith.constant 0 : index
    %0 = vector.load %arg2[%c0, %c0_0] : memref<16x256xf32, #tpu.memory_space<vmem>>, vector<16x256xf32>
    %c0_1 = arith.constant 0 : index
    %c0_2 = arith.constant 0 : index
    %c0_3 = arith.constant 0 : index
    %1 = vector.load %arg1[%c0_1, %c0_2, %c0_3] : memref<8x32x16xf32, #tpu.memory_space<vmem>>, vector<8x8x16xf32>
    %cst = arith.constant dense<0.000000e+00> : vector<8x16xf32>
    %2 = vector.multi_reduction <add>, %1, %cst [1] : vector<8x8x16xf32> to vector<8x16xf32>
    %cst_4 = arith.constant 1.250000e-01 : f32
    %3 = vector.broadcast %cst_4 : f32 to vector<8x16xf32>
    %4 = arith.mulf %2, %3 : vector<8x16xf32>
    %cst_5 = arith.constant dense<0.000000e+00> : vector<8x256xf32>
    %5 = tpu.matmul %4, %0, %cst_5 {dimension_numbers = #tpu.dot_dimension_numbers<[1], [0], [0], [1], [0, 0, 1, 1], [], []>, precision = #tpu.contract_precision<fp32>} : vector<8x16xf32>, vector<16x256xf32>, vector<8x256xf32> -> vector<8x256xf32>
    %6 = arith.mulf %5, %5 : vector<8x256xf32>
    %c0_6 = arith.constant 0 : index
    %c8 = arith.constant 8 : index
    %c0_7 = arith.constant 0 : index
    %7 = vector.load %arg1[%c0_6, %c8, %c0_7] : memref<8x32x16xf32, #tpu.memory_space<vmem>>, vector<8x8x16xf32>
    %cst_8 = arith.constant dense<0.000000e+00> : vector<8x16xf32>
    %8 = vector.multi_reduction <add>, %7, %cst_8 [1] : vector<8x8x16xf32> to vector<8x16xf32>
    %cst_9 = arith.constant 1.250000e-01 : f32
    %9 = vector.broadcast %cst_9 : f32 to vector<8x16xf32>
    %10 = arith.mulf %8, %9 : vector<8x16xf32>
    %cst_10 = arith.constant dense<0.000000e+00> : vector<8x256xf32>
    %11 = tpu.matmul %10, %0, %cst_10 {dimension_numbers = #tpu.dot_dimension_numbers<[1], [0], [0], [1], [0, 0, 1, 1], [], []>, precision = #tpu.contract_precision<fp32>} : vector<8x16xf32>, vector<16x256xf32>, vector<8x256xf32> -> vector<8x256xf32>
    %12 = arith.mulf %11, %11 : vector<8x256xf32>
    %13 = arith.addf %6, %12 : vector<8x256xf32>
    %c0_11 = arith.constant 0 : index
    %c16 = arith.constant 16 : index
    %c0_12 = arith.constant 0 : index
    %14 = vector.load %arg1[%c0_11, %c16, %c0_12] : memref<8x32x16xf32, #tpu.memory_space<vmem>>, vector<8x8x16xf32>
    %cst_13 = arith.constant dense<0.000000e+00> : vector<8x16xf32>
    %15 = vector.multi_reduction <add>, %14, %cst_13 [1] : vector<8x8x16xf32> to vector<8x16xf32>
    %cst_14 = arith.constant 1.250000e-01 : f32
    %16 = vector.broadcast %cst_14 : f32 to vector<8x16xf32>
    %17 = arith.mulf %15, %16 : vector<8x16xf32>
    %cst_15 = arith.constant dense<0.000000e+00> : vector<8x256xf32>
    %18 = tpu.matmul %17, %0, %cst_15 {dimension_numbers = #tpu.dot_dimension_numbers<[1], [0], [0], [1], [0, 0, 1, 1], [], []>, precision = #tpu.contract_precision<fp32>} : vector<8x16xf32>, vector<16x256xf32>, vector<8x256xf32> -> vector<8x256xf32>
    %19 = arith.mulf %18, %18 : vector<8x256xf32>
    %20 = arith.addf %13, %19 : vector<8x256xf32>
    %c0_16 = arith.constant 0 : index
    %c24 = arith.constant 24 : index
    %c0_17 = arith.constant 0 : index
    %21 = vector.load %arg1[%c0_16, %c24, %c0_17] : memref<8x32x16xf32, #tpu.memory_space<vmem>>, vector<8x8x16xf32>
    %cst_18 = arith.constant dense<0.000000e+00> : vector<8x16xf32>
    %22 = vector.multi_reduction <add>, %21, %cst_18 [1] : vector<8x8x16xf32> to vector<8x16xf32>
    %cst_19 = arith.constant 1.250000e-01 : f32
    %23 = vector.broadcast %cst_19 : f32 to vector<8x16xf32>
    %24 = arith.mulf %22, %23 : vector<8x16xf32>
    %cst_20 = arith.constant dense<0.000000e+00> : vector<8x256xf32>
    %25 = tpu.matmul %24, %0, %cst_20 {dimension_numbers = #tpu.dot_dimension_numbers<[1], [0], [0], [1], [0, 0, 1, 1], [], []>, precision = #tpu.contract_precision<fp32>} : vector<8x16xf32>, vector<16x256xf32>, vector<8x256xf32> -> vector<8x256xf32>
    %26 = arith.mulf %25, %25 : vector<8x256xf32>
    %27 = arith.addf %20, %26 : vector<8x256xf32>
    %cst_21 = arith.constant 0.000000e+00 : f32
    %28 = vector.broadcast %cst_21 : f32 to vector<8x256xf32>
    %29 = arith.maximumf %27, %28 : vector<8x256xf32>
    %cst_22 = arith.constant dense<0xFF800000> : vector<8xf32>
    %30 = vector.multi_reduction <maximumf>, %29, %cst_22 [1] : vector<8x256xf32> to vector<8xf32>
    %31 = vector.shape_cast %30 : vector<8xf32> to vector<8x1xf32>
    %32 = vector.broadcast %31 : vector<8x1xf32> to vector<8x256xf32>
    %33 = arith.subf %32, %29 : vector<8x256xf32>
    %c0_23 = arith.constant 0 : index
    %c0_24 = arith.constant 0 : index
    %34 = vector.load %arg4[%c0_23, %c0_24] : memref<1x256xf32, #tpu.memory_space<vmem>>, vector<1x256xf32>
    %35 = vector.broadcast %34 : vector<1x256xf32> to vector<8x256xf32>
    %36 = arith.mulf %33, %35 : vector<8x256xf32>
    %c0_25 = arith.constant 0 : index
    %c0_26 = arith.constant 0 : index
    %37 = vector.load %arg3[%c0_25, %c0_26] : memref<16x256xf32, #tpu.memory_space<vmem>>, vector<16x256xf32>
    %cst_27 = arith.constant dense<0.000000e+00> : vector<8x16xf32>
    %38 = tpu.matmul %36, %37, %cst_27 {dimension_numbers = #tpu.dot_dimension_numbers<[1], [1], [0], [0], [0, 0, 1, 0], [], []>, precision = #tpu.contract_precision<fp32>} : vector<8x256xf32>, vector<16x256xf32>, vector<8x16xf32> -> vector<8x16xf32>
    %cst_28 = arith.constant dense<0.000000e+00> : vector<8x256xf32>
    %39 = tpu.matmul %38, %37, %cst_28 {dimension_numbers = #tpu.dot_dimension_numbers<[1], [0], [0], [1], [0, 0, 1, 1], [], []>, precision = #tpu.contract_precision<fp32>} : vector<8x16xf32>, vector<16x256xf32>, vector<8x256xf32> -> vector<8x256xf32>
    %40 = tpu.reciprocal %39 : vector<8x256xf32> -> vector<8x256xf32>
    %41 = arith.mulf %36, %40 : vector<8x256xf32>
    %c0_29 = arith.constant 0 : index
    %c0_30 = arith.constant 0 : index
    %42 = vector.load %arg5[%c0_29, %c0_30] : memref<8x256xf32, #tpu.memory_space<vmem>>, vector<8x256xf32>
    tpu.vector_store %arg5[%c0_29, %c0_30], %41 {strides = array<i32>} : memref<8x256xf32, #tpu.memory_space<vmem>>, vector<8x256xf32>,
    return
  }
  func.func @transform_0(%arg0: i32) -> (i32, i32, i32) {
    %c0_i32 = arith.constant 0 : i32
    %c0_i32_0 = arith.constant 0 : i32
    %c0_i32_1 = arith.constant 0 : i32
    return %arg0, %c0_i32, %c0_i32_0 : i32, i32, i32
  }
  func.func @transform_1(%arg0: i32) -> (i32, i32) {
    %c0_i32 = arith.constant 0 : i32
    %c0_i32_0 = arith.constant 0 : i32
    %c0_i32_1 = arith.constant 0 : i32
    return %c0_i32, %c0_i32_0 : i32, i32
  }
  func.func @transform_2(%arg0: i32) -> (i32, i32) {
    %c0_i32 = arith.constant 0 : i32
    %c0_i32_0 = arith.constant 0 : i32
    %c0_i32_1 = arith.constant 0 : i32
    return %c0_i32, %c0_i32_0 : i32, i32
  }
  func.func @transform_3(%arg0: i32) -> (i32, i32) {
    %c0_i32 = arith.constant 0 : i32
    %c0_i32_0 = arith.constant 0 : i32
    %c0_i32_1 = arith.constant 0 : i32
    return %c0_i32, %c0_i32_0 : i32, i32
  }
  func.func @transform_4(%arg0: i32) -> (i32, i32) {
    %c0_i32 = arith.constant 0 : i32
    %c0_i32_0 = arith.constant 0 : i32
    return %arg0, %c0_i32 : i32, i32
  }
}

</mosaic_0001>

<bundles_post_ra>
// kernel: tpu_custom_call.1
= control target key start
LH: loop header
LB: loop body
LE: loop exit
PB: predicated region body
PF: predicated region fallthrough
CT: control target
= control target key end

     0   :  { %9 = vsyncpa [#allocation3], 0  ;;  %s3293_s0 = inlined_call_operand.vmem [shape: f32[16,32,16], index: 0, kind: input, shape index: {}]   ;;  %s3294_s1 = inlined_call_operand.vmem [shape: f32[16,256], index: 1, kind: input, shape index: {}]   ;;  %s3295_s2 = inlined_call_operand.vmem [shape: f32[16,256], index: 2, kind: input, shape index: {}]   ;;  %s3296_s3 = inlined_call_operand.vmem [shape: f32[1,256], index: 3, kind: input, shape index: {}]   ;;  %s3297_s4 = inlined_call_operand.hbm [shape: f32[16,256], index: 4, kind: output, shape index: {}]  }
   0x1   :  { %11 = vsyncpa [#allocation3 + $0x1], 0  ;;  %s2768_s15 = smov 0   ;;  %s2770_s16 = smov 0  }
   0x2   :  { %s2772_s17 = smov 0   ;;  %s2774_s18 = smov 0  }
   0x3 LB: > { %s2789_s19 = sadd.s32 4294967295, %s2741_s18   ;;  %s2621_s20 = sadd.s32 4294967294, %s2741_s18   ;;  %s2741_s18 = sphi %s2774_s18, %s3303_s18   ;;  %s2737_s17 = sphi %s2772_s17, %s3302_s17   ;;  %s2733_s16 = sphi %s2770_s16, %s3301_s16   ;;  %s2729_s15 = sphi %s2768_s15, %s3300_s15  }
   0x4   : > { %s2793_s21 = sadd.s32 1, %s2741_s18   ;;  %s113_s22 = sadd.s32 1, %s2737_s17 }
   0x5   : > { %s110_s23 = ssub.s32 %s2741_s18, %s2793_s21  ;;  %p123_p0 = scmp.ne.s32.totalorder %s2737_s17, %s2733_s16 }
   0x6   : > { %p111_p1 = scmp.eq.s32.totalorder %s110_s23, 0  ;;  %p124_p2 = scmp.eq.s32.totalorder %s2789_s19, 1 }
   0x7   : > { %p129_p3 = scmp.ne.s32.totalorder %s2733_s16, %s2729_s15  ;;  %p130_p4 = scmp.eq.s32.totalorder %s2621_s20, 1 }
   0x8   : > { %s2804_s24 = scalar_select %p111_p1, %s2737_s17, %s113_s22  }
   0x9   : > { %p2806_p5 = por %p124_p2, %p123_p0  ;;  %p2810_p6 = por %p130_p4, %p129_p3 }
   0xa   : > { %p2624_p7 = scmp.ge.s32.totalorder %s2741_s18, 1  ;;  %p167_p8 = scmp.lt.s32.totalorder %s2741_s18, 3 }
   0xc   : > { %p168_p9 = pnand %p2624_p7, %p167_p8 }
   0xd   : > { %s2626_s5 = sshll.u32 (!%p168_p9), %s2789_s19, 3  ;;  %s191_s7 = sand.u32 (!%p168_p9), 1, %s2733_s16  }
   0xe   : > { %171 = sbr.rel (%p168_p9) target bundleno = 751 (0x2ef), region = 36  ;;  %p195_p10 = scmp.lt.s32.totalorder (!%p168_p9), %s2626_s5, 15 }
   0xf   : > { %s2625_s8 = sshll.u32 (!%p168_p9), %s191_s7, 4  ;;  %s2699_s29 = scalar_lea.hbm (!%p168_p9), %s3297_s4, 32 }
  0x10   : > { %s193_s9 = scalar_lea.vmem (!%p168_p9), [#allocation2], %s2625_s8 }
  0x11   : > { %s2559_s14 = sshll.u32 (!%p168_p9), %s193_s9, 4  ;;  %s2560_s14 = int_to_ptr.vmem [resolvable:$true] %s2559_s14 }
  0x13   : > { %v203_v0 = vld [vmem:[%s3294_s1 + $0x10] sm:$0xff]  ;;  %v201_v1 = vld [vmem:[%s3294_s1] sm:$0xff]  ;;  %v204_v4 = vld [vmem:[%s3294_s1 + $0x18] sm:$0xff]  ;;  %s3305_s5 = smov (!%p195_p10, %s2626_s5), 15  ;;  %vm213_vm0 = vcmask 130048   ;;  %vm286_vm1 = vcmask 1041409  }
  0x14   : > { %v2823_v2 = vand.u32 4294901760, %v203_v0  ;;  %v2825_v3 = vand.u32 4294901760, %v201_v1  ;;  %v2830_v5 = vand.u32 4294901760, %v204_v4  ;;  %v202_v8 = vld [vmem:[%s3294_s1 + $0x8] sm:$0xff]  ;;  %s2634_s10 = sshll.u32 %s3305_s5, 5  ;;  %vm288_vm2 = vcmask 1042434  }
  0x15   : > { %v2846_v10 = vand.u32 4294901760, %v202_v8  ;;  %s2859_s13 = scalar_lea.vmem %s3293_s0, %s2634_s10  ;;  %vm290_vm3 = vcmask 1043459   ;;  %vm292_vm4 = vcmask 1044484   ;;  %vm294_vm5 = vcmask 1045509   ;;  %s2635_s10 = sshll.u32 %s2789_s19, 4 }
  0x16   : > { %v2833_v6 = vsub.f32 %v203_v0, %v2823_v2  ;;  %v2836_v7 = vsub.f32 %v201_v1, %v2825_v3  ;;  %401 = vmatpush.msra.mxu3 %v2823_v2  ;;  %317 = vmatpush.msra.mxu0 %v2823_v2  ;;  %v2844_v9 = vsub.f32 %v204_v4, %v2830_v5  ;;  %v205_v14 = vld [vmem:[%s2859_s13] sm:$0xff]  ;;  %vm296_vm6 = vcmask 1046534   ;;  %s2546_s19 = scalar_lea.sflag [#allocation3], %s191_s7 }
  0x17   : > { %v206_v15 = vld [vmem:[%s2859_s13 + $0x20] sm:$0xff]  ;;  %v2875_v19 = vsub.f32 %v202_v8, %v2846_v10  ;;  %v214_v23 = vsel %vm213_vm0, %v205_v14, 0.0  ;;  %vm298_vm7 = vcmask 1047559  }
  0x18   : > { %376 = vmatpush.msra.mxu2 %v2833_v6  ;;  %v2850_v11 = vand.u32 4294901760, %v2833_v6  ;;  %403 = vmatpush.msra.mxu3 %v2825_v3  ;;  %v2854_v12 = vand.u32 4294901760, %v2836_v7  ;;  %v2863_v13 = vand.u32 4294901760, %v2844_v9  ;;  %v207_v16 = vld [vmem:[%s2859_s13 + $0x40] sm:$0xff]  ;;  %v221_v24 = vsel %vm213_vm0, %v206_v15, 0.0 }
  0x19   : > { %319 = vmatpush.msra.mxu0 %v2825_v3  ;;  %v208_v20 = vld [vmem:[%s2859_s13 + $0x60] sm:$0xff]  ;;  %v228_v25 = vsel %vm213_vm0, %v207_v16, 0.0  ;;  %v215_v29 = vrot.slane %v214_v23, 4  ;;  %v222_v30 = vrot.slane %v221_v24, 4 }
  0x1a   : > { %379 = vmatpush.msra.mxu2 %v2836_v7  ;;  %v346_v17 = vsub.f32 %v2833_v6, %v2850_v11  ;;  %v352_v18 = vsub.f32 %v2836_v7, %v2854_v12  ;;  %v209_v21 = vld [vmem:[%s2859_s13 + $0x80] sm:$0xff]  ;;  %v505_v26 = vsub.f32 %v2844_v9, %v2863_v13  ;;  %v229_v31 = vrot.slane %v228_v25, 4 }
  0x1b   : > { %428 = vmatpush.msrb.mxu0 %v2850_v11  ;;  %v210_v22 = vld [vmem:[%s2859_s13 + $0xa0] sm:$0xff]  ;;  %v235_v32 = vsel %vm213_vm0, %v208_v20, 0.0  ;;  %v242_v34 = vsel %vm213_vm0, %v209_v21, 0.0  ;;  %v216_v37 = vadd.f32 %v215_v29, %v214_v23  ;;  %v223_v38 = vadd.f32 %v222_v30, %v221_v24 }
  0x1c   : > { %476 = vmatpush.msrb.mxu2 %v2830_v5  ;;  %v211_v27 = vld [vmem:[%s2859_s13 + $0xc0] sm:$0xff]  ;;  %v236_v33 = vrot.slane %v235_v32, 4  ;;  %v249_v35 = vsel %vm213_vm0, %v210_v22, 0.0  ;;  %v230_v39 = vadd.f32 %v229_v31, %v228_v25  ;;  %v243_v40 = vrot.slane %v242_v34, 4 }
  0x1d   : > { %v212_v28 = vld [vmem:[%s2859_s13 + $0xe0] sm:$0xff]  ;;  %432 = vmatpush.msrb.mxu0 %v2854_v12  ;;  %v256_v36 = vsel %vm213_vm0, %v211_v27, 0.0  ;;  %v250_v42 = vrot.slane %v249_v35, 4  ;;  %v217_v45 = vrot.slane %v216_v37, 2  ;;  %v224_v46 = vrot.slane %v223_v38, 2 }
  0x1e   : > { %478 = vmatpush.msrb.mxu2 %v2846_v10  ;;  %v237_v41 = vadd.f32 %v236_v33, %v235_v32  ;;  %v257_v43 = vrot.slane %v256_v36, 4  ;;  %v263_v44 = vsel %vm213_vm0, %v212_v28, 0.0  ;;  %v231_v47 = vrot.slane %v230_v39, 2 }
  0x1f   : > { %v244_v48 = vadd.f32 %v243_v40, %v242_v34  ;;  %v251_v50 = vadd.f32 %v250_v42, %v249_v35  ;;  %v264_v52 = vrot.slane %v263_v44, 4  ;;  %v218_v53 = vadd.f32 %v217_v45, %v216_v37  ;;  %v622_v35 = vld [vmem:[%s2859_s13 + $0x8] sm:$0xff] }
  0x20   : > { %v238_v49 = vrot.slane %v237_v41, 2  ;;  %v258_v51 = vadd.f32 %v257_v43, %v256_v36  ;;  %v225_v54 = vadd.f32 %v224_v46, %v223_v38  ;;  %v232_v55 = vadd.f32 %v231_v47, %v230_v39  ;;  %v623_v40 = vld [vmem:[%s2859_s13 + $0x28] sm:$0xff] }
  0x21   : > { %v245_v56 = vrot.slane %v244_v48, 2  ;;  %v252_v58 = vrot.slane %v251_v50, 2  ;;  %v265_v60 = vadd.f32 %v264_v52, %v263_v44  ;;  %v219_v61 = vrot.slane %v218_v53, 1  ;;  %v624_v45 = vld [vmem:[%s2859_s13 + $0x48] sm:$0xff] }
  0x22   : > { %v239_v57 = vadd.f32 %v238_v49, %v237_v41  ;;  %v259_v59 = vrot.slane %v258_v51, 2  ;;  %v226_v62 = vrot.slane %v225_v54, 1  ;;  %v233_v63 = vrot.slane %v232_v55, 1  ;;  %v625_v47 = vld [vmem:[%s2859_s13 + $0x68] sm:$0xff] }
  0x23   : > { %v246_v0 = vadd.f32 %v245_v56, %v244_v48  ;;  %v253_v4 = vadd.f32 %v252_v58, %v251_v50  ;;  %v266_v14 = vrot.slane %v265_v60, 2  ;;  %v220_v15 = vadd.f32 %v219_v61, %v218_v53 }
  0x24   : > { %v240_v1 = vrot.slane %v239_v57, 1  ;;  %v260_v8 = vadd.f32 %v259_v59, %v258_v51  ;;  %v227_v16 = vadd.f32 %v226_v62, %v225_v54  ;;  %v234_v20 = vadd.f32 %v233_v63, %v232_v55  ;;  %v626_v54 = vld [vmem:[%s2859_s13 + $0x88] sm:$0xff] }
  0x25   : > { %v247_v21 = vrot.slane %v246_v0, 1  ;;  %v254_v23 = vrot.slane %v253_v4, 1  ;;  %v267_v25 = vadd.f32 %v266_v14, %v265_v60  ;;  %v270_v28 = vmul.f32 0.125, %v220_v15  ;;  %v627_v63 = vld [vmem:[%s2859_s13 + $0xa8] sm:$0xff] }
  0x26   : > { %v241_v22 = vadd.f32 %v240_v1, %v239_v57  ;;  %v261_v24 = vrot.slane %v260_v8, 1  ;;  %v271_v29 = vmul.f32 0.125, %v227_v16  ;;  %v272_v30 = vmul.f32 0.125, %v234_v20 }
  0x27   : > { %v248_v27 = vadd.f32 %v247_v21, %v246_v0  ;;  %v255_v31 = vadd.f32 %v254_v23, %v253_v4  ;;  %v268_v33 = vrot.slane %v267_v25, 1  ;;  %v2900_v38 = vand.u32 4294901760, %v346_v17  ;;  %v628_v0 = vld [vmem:[%s2859_s13 + $0xc8] sm:$0xff] }
  0x28   : > { %v262_v32 = vadd.f32 %v261_v24, %v260_v8  ;;  %v273_v34 = vmul.f32 0.125, %v241_v22  ;;  %v287_v37 = vsel %vm286_vm1, %v271_v29, %v270_v28  ;;  %v2905_v39 = vand.u32 4294901760, %v352_v18 }
  0x29   : > { %v274_v36 = vmul.f32 0.125, %v248_v27  ;;  %v269_v41 = vadd.f32 %v268_v33, %v267_v25  ;;  %v275_v42 = vmul.f32 0.125, %v255_v31  ;;  %v289_v44 = vsel %vm288_vm2, %v272_v30, %v287_v37  ;;  %348 = vmatpush.msra.mxu1 %v2900_v38 }
  0x2a   : > { %v276_v43 = vmul.f32 0.125, %v262_v32  ;;  %v291_v46 = vsel %vm290_vm3, %v273_v34, %v289_v44  ;;  %v2915_v17 = vand.u32 4294901760, %v505_v26  ;;  %v2918_v18 = vand.u32 4294901760, %v2875_v19 }
  0x2b   : > { %v630_v48 = vsel %vm213_vm0, %v622_v35, 0.0  ;;  %v277_v49 = vmul.f32 0.125, %v269_v41  ;;  %v293_v50 = vsel %vm292_vm4, %v274_v36, %v291_v46  ;;  %v637_v52 = vsel %vm213_vm0, %v623_v40, 0.0  ;;  %354 = vmatpush.msra.mxu1 %v2905_v39  ;;  %v629_v40 = vld [vmem:[%s2859_s13 + $0xe8] sm:$0xff] }
  0x2c   : > { %v631_v51 = vrot.slane %v630_v48, 4  ;;  %v295_v53 = vsel %vm294_vm5, %v275_v42, %v293_v50  ;;  %507 = vmatpush.msrb.mxu3 %v2915_v17  ;;  %v511_v26 = vsub.f32 %v2875_v19, %v2918_v18  ;;  %v638_v55 = vrot.slane %v637_v52, 4 }
  0x2d   : > { %v644_v56 = vsel %vm213_vm0, %v624_v45, 0.0  ;;  %v297_v57 = vsel %vm296_vm6, %v276_v43, %v295_v53  ;;  %453 = vmatpush.msrb.mxu1 %v2823_v2  ;;  %v651_v60 = vsel %vm213_vm0, %v625_v47, 0.0  ;;  %v658_v16 = vsel %vm213_vm0, %v626_v54, 0.0 }
  0x2e   : > { %v632_v58 = vadd.f32 %v631_v51, %v630_v48  ;;  %v645_v59 = vrot.slane %v644_v56, 4  ;;  %v299_v61 = vsel %vm298_vm7, %v277_v49, %v297_v57  ;;  %v2935_v62 = vand.u32 4294901760, %v511_v26 }
  0x2f   : > { %v639_v1 = vadd.f32 %v638_v55, %v637_v52  ;;  %v652_v4 = vrot.slane %v651_v60, 4  ;;  %v300_v8 = vsel %vm213_vm0, %v299_v61, 0  ;;  %455 = vmatpush.msrb.mxu1 %v2825_v3  ;;  %v659_v23 = vrot.slane %v658_v16, 4 }
  0x30   : > { %v633_v14 = vrot.slane %v632_v58, 2  ;;  %v646_v15 = vadd.f32 %v645_v59, %v644_v56  ;;  %v2942_v20 = vand.u32 4294901760, %v300_v8  ;;  %513 = vmatpush.msrb.mxu3 %v2935_v62  ;;  %v665_v27 = vsel %vm213_vm0, %v627_v63, 0.0  ;;  %v1033_v59 = vld [vmem:[%s2859_s13 + $0x10] sm:$0xff] }
  0x31   : > { %v640_v21 = vrot.slane %v639_v1, 2  ;;  %v653_v22 = vadd.f32 %v652_v4, %v651_v60  ;;  %v672_v28 = vsel %vm213_vm0, %v628_v0, 0.0  ;;  %v660_v32 = vadd.f32 %v659_v23, %v658_v16 }
  0x32   : > { %v634_v24 = vadd.f32 %v633_v14, %v632_v58  ;;  %v647_v25 = vrot.slane %v646_v15, 2  ;;  %v2948_v29 = vsub.f32 %v300_v8, %v2942_v20  ;;  %356 = vmatmul.f32.vlgmr.msra.gmra.mxu1 %v2942_v20  ;;  %v666_v35 = vrot.slane %v665_v27, 4 }
  0x33   : > { %v641_v30 = vadd.f32 %v640_v21, %v639_v1  ;;  %v654_v31 = vrot.slane %v653_v22, 2  ;;  %560 = vmatpush.msra.mxu1 %v2830_v5  ;;  %v673_v36 = vrot.slane %v672_v28, 4  ;;  %v661_v43 = vrot.slane %v660_v32, 2 }
  0x34   : > { %v635_v33 = vrot.slane %v634_v24, 1  ;;  %v648_v34 = vadd.f32 %v647_v25, %v646_v15  ;;  %382 = vmatmul.f32.vlgmr.msra.gmra.mxu2 %v2948_v29  ;;  %v2954_v37 = vand.u32 4294901760, %v2948_v29  ;;  %v667_v46 = vadd.f32 %v666_v35, %v665_v27  ;;  %v1034_v15 = vld [vmem:[%s2859_s13 + $0x30] sm:$0xff] }
  0x35   : > { %v642_v41 = vrot.slane %v641_v30, 1  ;;  %v655_v42 = vadd.f32 %v654_v31, %v653_v22  ;;  %587 = vmatpush.msra.mxu2 %v2863_v13  ;;  %562 = vmatpush.msra.mxu1 %v2846_v10  ;;  %v674_v47 = vadd.f32 %v673_v36, %v672_v28  ;;  %v662_v51 = vadd.f32 %v661_v43, %v660_v32  ;;  %v1035_v28 = vld [vmem:[%s2859_s13 + $0x50] sm:$0xff] }
  0x36   : > { %v636_v44 = vadd.f32 %v635_v33, %v634_v24  ;;  %v649_v45 = vrot.slane %v648_v34, 1  ;;  %407 = vmatmul.f32.vlgmr.msra.gmra.mxu3 %v2954_v37  ;;  %v323_v48 = vsub.f32 %v2948_v29, %v2954_v37  ;;  %v668_v53 = vrot.slane %v667_v46, 2 }
  0x37   : > { %v643_v49 = vadd.f32 %v642_v41, %v641_v30  ;;  %v656_v50 = vrot.slane %v655_v42, 1  ;;  %612 = vmatpush.msra.mxu3 %v2830_v5  ;;  %591 = vmatpush.msra.mxu2 %v2918_v18  ;;  %v675_v26 = vrot.slane %v674_v47, 2  ;;  %v679_v54 = vsel %vm213_vm0, %v629_v40, 0.0  ;;  %v1036_v30 = vld [vmem:[%s2859_s13 + $0x70] sm:$0xff] }
  0x38   : > { %v650_v52 = vadd.f32 %v649_v45, %v648_v34  ;;  %v324_v55 = vand.u32 4294901760, %v323_v48  ;;  %v663_v57 = vrot.slane %v662_v51, 1  ;;  %v680_v58 = vrot.slane %v679_v54, 4  ;;  %v1037_v41 = vld [vmem:[%s2859_s13 + $0x90] sm:$0xff] }
  0x39   : > { %v657_v56 = vadd.f32 %v656_v50, %v655_v42  ;;  %614 = vmatpush.msra.mxu3 %v2846_v10  ;;  %v669_v60 = vadd.f32 %v668_v53, %v667_v46  ;;  %v676_v61 = vadd.f32 %v675_v26, %v674_v47  ;;  %v686_v63 = vmul.f32 0.125, %v636_v44  ;;  %v1038_v42 = vld [vmem:[%s2859_s13 + $0xb0] sm:$0xff] }
  0x3a   : > { %v687_v0 = vmul.f32 0.125, %v643_v49  ;;  %325 = vmatmul.f32.vlgmr.msra.gmra.mxu0 %v324_v55  ;;  %457 = vmatmul.f32.vlgmr.msrb.gmra.mxu1 %v2942_v20  ;;  %v664_v1 = vadd.f32 %v663_v57, %v662_v51  ;;  %v681_v4 = vadd.f32 %v680_v58, %v679_v54  ;;  %v688_v8 = vmul.f32 0.125, %v650_v52  ;;  %v1039_v26 = vld [vmem:[%s2859_s13 + $0xd0] sm:$0xff] }
  0x3b   : > { %v689_v14 = vmul.f32 0.125, %v657_v56  ;;  %535 = vmatpush.msra.mxu0 %v2844_v9  ;;  %757 = vmatpush.msrb.mxu1 %v2900_v38  ;;  %v670_v16 = vrot.slane %v669_v60, 1  ;;  %v677_v21 = vrot.slane %v676_v61, 1  ;;  %v1041_v23 = vsel %vm213_vm0, %v1033_v59, 0.0 }
  0x3c   : > { %v702_v22 = vsel %vm286_vm1, %v687_v0, %v686_v63  ;;  %484 = vmatmul.f32.vlgmr.msrb.gmra.mxu2 %v324_v55  ;;  %v682_v24 = vrot.slane %v681_v4, 2  ;;  %v690_v25 = vmul.f32 0.125, %v664_v1  ;;  %v1042_v31 = vrot.slane %v1041_v23, 4 }
  0x3d   : > { %v703_v27 = vsel %vm288_vm2, %v688_v8, %v702_v22  ;;  %538 = vmatpush.msra.mxu0 %v2875_v19  ;;  %785 = vmatpush.msrb.mxu2 %v2833_v6  ;;  %v671_v32 = vadd.f32 %v670_v16, %v669_v60  ;;  %v678_v33 = vadd.f32 %v677_v21, %v676_v61  ;;  %v1048_v35 = vsel %vm213_vm0, %v1034_v15, 0.0 }
  0x3e   : > { %v704_v34 = vsel %vm290_vm3, %v689_v14, %v703_v27  ;;  %515 = vmatmul.f32.vlgmr.msrb.gmra.mxu3 %v2942_v20  ;;  %v683_v36 = vadd.f32 %v682_v24, %v681_v4  ;;  %763 = vmatpush.msrb.mxu1 %v2905_v39  ;;  %v1043_v43 = vadd.f32 %v1042_v31, %v1041_v23  ;;  %v1049_v44 = vrot.slane %v1048_v35, 4  ;;  %v1040_v24 = vld [vmem:[%s2859_s13 + $0xf0] sm:$0xff] }
  0x3f   : > { %v705_v40 = vsel %vm292_vm4, %v690_v25, %v704_v34  ;;  %810 = vmatpush.msrb.mxu3 %v2823_v2  ;;  %788 = vmatpush.msrb.mxu2 %v2836_v7  ;;  %v691_v45 = vmul.f32 0.125, %v671_v32  ;;  %v692_v46 = vmul.f32 0.125, %v678_v33  ;;  %v1055_v47 = vsel %vm213_vm0, %v1035_v28, 0.0 }
  0x40   : > { %v1062_v48 = vsel %vm213_vm0, %v1036_v30, 0.0  ;;  %v684_v49 = vrot.slane %v683_v36, 1  ;;  %v1044_v50 = vrot.slane %v1043_v43, 2  ;;  %v1050_v51 = vadd.f32 %v1049_v44, %v1048_v35 }
  0x41   : > { %v1056_v52 = vrot.slane %v1055_v47, 4  ;;  %v706_v53 = vsel %vm294_vm5, %v691_v45, %v705_v40  ;;  %812 = vmatpush.msrb.mxu3 %v2825_v3  ;;  %v1063_v54 = vrot.slane %v1062_v48, 4  ;;  %v1069_v55 = vsel %vm213_vm0, %v1037_v41, 0.0 }
  0x42   : > { %v1076_v56 = vsel %vm213_vm0, %v1038_v42, 0.0  ;;  %434 = vmatmul.f32.vlgmr.msrb.gmra.mxu0 %v2942_v20  ;;  %566 = vmatmul.f32.vlgmr.msra.gmra.mxu1 %v2954_v37  ;;  %v685_v57 = vadd.f32 %v684_v49, %v683_v36  ;;  %v707_v58 = vsel %vm296_vm6, %v692_v46, %v706_v53  ;;  %v1045_v59 = vadd.f32 %v1044_v50, %v1043_v43 }
  0x43   : > { %v1051_v60 = vrot.slane %v1050_v51, 2  ;;  %726 = vmatpush.msrb.mxu0 %v2823_v2  ;;  %862 = vmatpush.msra.mxu1 %v2823_v2  ;;  %v1057_v61 = vadd.f32 %v1056_v52, %v1055_v47  ;;  %v1064_v63 = vadd.f32 %v1063_v54, %v1062_v48  ;;  %v1070_v0 = vrot.slane %v1069_v55, 4  ;;  %v1444_v54 = vld [vmem:[%s2859_s13 + $0x18] sm:$0xff] }
  0x44   : > { %v1077_v1 = vrot.slane %v1076_v56, 4  ;;  %593 = vmatmul.f32.vlgmr.msra.gmra.mxu2 %v2942_v20  ;;  %v693_v4 = vmul.f32 0.125, %v685_v57  ;;  %v1046_v8 = vrot.slane %v1045_v59, 1  ;;  %v1083_v37 = vsel %vm213_vm0, %v1039_v26, 0.0 }
  0x45   : > { %v1052_v14 = vadd.f32 %v1051_v60, %v1050_v51  ;;  %728 = vmatpush.msrb.mxu0 %v2825_v3  ;;  %885 = vmatpush.msra.mxu2 %v2830_v5  ;;  %v1058_v15 = vrot.slane %v1057_v61, 2  ;;  %v1065_v16 = vrot.slane %v1064_v63, 2  ;;  %v1071_v21 = vadd.f32 %v1070_v0, %v1069_v55  ;;  %v1445_v55 = vld [vmem:[%s2859_s13 + $0x38] sm:$0xff] }
  0x46   : > { %v1078_v22 = vadd.f32 %v1077_v1, %v1076_v56  ;;  %616 = vmatmul.f32.vlgmr.msra.gmra.mxu3 %v2942_v20  ;;  %v708_v23 = vsel %vm298_vm7, %v693_v4, %v707_v58  ;;  %864 = vmatpush.msra.mxu1 %v2825_v3  ;;  %v1047_v25 = vadd.f32 %v1046_v8, %v1045_v59  ;;  %v1084_v28 = vrot.slane %v1083_v37, 4  ;;  %v1446_v1 = vld [vmem:[%s2859_s13 + $0x58] sm:$0xff] }
  0x47   : > { %v1053_v27 = vrot.slane %v1052_v14, 1  ;;  %v709_v30 = vsel %vm213_vm0, %v708_v23, 0  ;;  %916 = vmatpush.msra.mxu3 %v2915_v17  ;;  %887 = vmatpush.msra.mxu2 %v2846_v10  ;;  %v1059_v31 = vadd.f32 %v1058_v15, %v1057_v61  ;;  %v1066_v32 = vadd.f32 %v1065_v16, %v1064_v63  ;;  %v1447_v23 = vld [vmem:[%s2859_s13 + $0x78] sm:$0xff] }
  0x48   : > { %v1072_v33 = vrot.slane %v1071_v21, 2  ;;  %v3010_v34 = vand.u32 4294901760, %v709_v30  ;;  %v1079_v35 = vrot.slane %v1078_v22, 2  ;;  %v1085_v36 = vadd.f32 %v1084_v28, %v1083_v37 }
  0x49   : > { %v1054_v20 = vadd.f32 %v1053_v27, %v1052_v14  ;;  %922 = vmatpush.msra.mxu3 %v2935_v62  ;;  %v1060_v40 = vrot.slane %v1059_v31, 1  ;;  %v1067_v41 = vrot.slane %v1066_v32, 1  ;;  %v1090_v43 = vsel %vm213_vm0, %v1040_v24, 0.0 }
  0x4a   : > { %v1073_v42 = vadd.f32 %v1072_v33, %v1071_v21  ;;  %541 = vmatmul.f32.vlgmr.msra.gmra.mxu0 %v2948_v29  ;;  %v3016_v44 = vsub.f32 %v709_v30, %v3010_v34  ;;  %765 = vmatmul.f32.vlgmr.msrb.gmra.mxu1 %v3010_v34  ;;  %v1080_v45 = vadd.f32 %v1079_v35, %v1078_v22  ;;  %v1086_v46 = vrot.slane %v1085_v36, 2  ;;  %v1448_v33 = vld [vmem:[%s2859_s13 + $0x98] sm:$0xff] }
  0x4b   : > { %v1091_v47 = vrot.slane %v1090_v43, 4  ;;  %837 = vmatpush.msra.mxu0 %v2850_v11  ;;  %969 = vmatpush.msrb.mxu1 %v2830_v5  ;;  %v1061_v48 = vadd.f32 %v1060_v40, %v1059_v31  ;;  %v1068_v49 = vadd.f32 %v1067_v41, %v1066_v32  ;;  %v1097_v51 = vmul.f32 0.125, %v1047_v25 }
  0x4c   : > { %v1074_v50 = vrot.slane %v1073_v42, 1  ;;  %791 = vmatmul.f32.vlgmr.msrb.gmra.mxu2 %v3016_v44  ;;  %v3023_v29 = vand.u32 4294901760, %v3016_v44  ;;  %v1081_v52 = vrot.slane %v1080_v45, 1  ;;  %v1087_v53 = vadd.f32 %v1086_v46, %v1085_v36  ;;  %v1450_v46 = vld [vmem:[%s2859_s13 + $0xd8] sm:$0xff] }
  0x4d   : > { %v1092_v26 = vadd.f32 %v1091_v47, %v1090_v43  ;;  %841 = vmatpush.msra.mxu0 %v2854_v12  ;;  %996 = vmatpush.msrb.mxu2 %v2863_v13  ;;  %v1098_v57 = vmul.f32 0.125, %v1054_v20  ;;  %v1099_v58 = vmul.f32 0.125, %v1061_v48  ;;  %v1100_v59 = vmul.f32 0.125, %v1068_v49 }
  0x4e   : > { %v1075_v56 = vadd.f32 %v1074_v50, %v1073_v42  ;;  %816 = vmatmul.f32.vlgmr.msrb.gmra.mxu3 %v3023_v29  ;;  %v732_v60 = vsub.f32 %v3016_v44, %v3023_v29  ;;  %971 = vmatpush.msrb.mxu1 %v2846_v10  ;;  %v1082_v61 = vadd.f32 %v1081_v52, %v1080_v45  ;;  %v1088_v63 = vrot.slane %v1087_v53, 1  ;;  %v1449_v45 = vld [vmem:[%s2859_s13 + $0xb8] sm:$0xff] }
  0x4f   : > { %v1093_v0 = vrot.slane %v1092_v26, 2  ;;  %1021 = vmatpush.msrb.mxu3 %v2830_v5  ;;  %1000 = vmatpush.msrb.mxu2 %v2918_v18  ;;  %v1113_v8 = vsel %vm286_vm1, %v1098_v57, %v1097_v51  ;;  %v1452_v14 = vsel %vm213_vm0, %v1444_v54, 0.0  ;;  %v1459_v37 = vsel %vm213_vm0, %v1445_v55, 0.0 }
  0x50   : > { %v1101_v4 = vmul.f32 0.125, %v1075_v56  ;;  %v733_v15 = vand.u32 4294901760, %v732_v60  ;;  %v1089_v16 = vadd.f32 %v1088_v63, %v1087_v53  ;;  %v1102_v22 = vmul.f32 0.125, %v1082_v61 }
  0x51   : > { %v1094_v21 = vadd.f32 %v1093_v0, %v1092_v26  ;;  %1023 = vmatpush.msrb.mxu3 %v2846_v10  ;;  %v1114_v24 = vsel %vm288_vm2, %v1099_v58, %v1113_v8  ;;  %v1453_v25 = vrot.slane %v1452_v14, 4  ;;  %v1460_v27 = vrot.slane %v1459_v37, 4 }
  0x52   : > { %v1466_v28 = vsel %vm213_vm0, %v1446_v1, 0.0  ;;  %734 = vmatmul.f32.vlgmr.msrb.gmra.mxu0 %v733_v15  ;;  %866 = vmatmul.f32.vlgmr.msra.gmra.mxu1 %v3010_v34  ;;  %v1103_v31 = vmul.f32 0.125, %v1089_v16  ;;  %v1115_v32 = vsel %vm290_vm3, %v1100_v59, %v1114_v24  ;;  %v1473_v41 = vsel %vm213_vm0, %v1447_v23, 0.0 }
  0x53   : > { %v1095_v30 = vrot.slane %v1094_v21, 1  ;;  %v1467_v20 = vrot.slane %v1466_v28, 4  ;;  %944 = vmatpush.msrb.mxu0 %v2844_v9  ;;  %1168 = vmatpush.msra.mxu1 %v2900_v38  ;;  %v1116_v35 = vsel %vm292_vm4, %v1101_v4, %v1115_v32  ;;  %v1454_v36 = vadd.f32 %v1453_v25, %v1452_v14 }
  0x54   : > { %v1461_v40 = vadd.f32 %v1460_v27, %v1459_v37  ;;  %893 = vmatmul.f32.vlgmr.msra.gmra.mxu2 %v733_v15  ;;  %v1117_v43 = vsel %vm294_vm5, %v1102_v22, %v1116_v35  ;;  %v1474_v48 = vrot.slane %v1473_v41, 4  ;;  %v1480_v52 = vsel %vm213_vm0, %v1448_v33, 0.0  ;;  %v1451_v15 = vld [vmem:[%s2859_s13 + $0xf8] sm:$0xff]  ;;  %s2557_s13 = scalar_lea.hbm %s3297_s4, %s2635_s10 }
  0x55   : > { %v1096_v42 = vadd.f32 %v1095_v30, %v1094_v21  ;;  %v1468_v47 = vadd.f32 %v1467_v20, %v1466_v28  ;;  %947 = vmatpush.msrb.mxu0 %v2875_v19  ;;  %1196 = vmatpush.msra.mxu2 %v2833_v6  ;;  %v1118_v49 = vsel %vm296_vm6, %v1103_v31, %v1117_v43  ;;  %v1455_v50 = vrot.slane %v1454_v36, 2  ;;  %s2561_s20 = sshll.u32 %s2557_s13, 4  ;;  %s2562_s20 = int_to_ptr.hbm [resolvable:$true] %s2561_s20 }
  0x56   : > { %v1462_v51 = vrot.slane %v1461_v40, 2  ;;  %924 = vmatmul.f32.vlgmr.msra.gmra.mxu3 %v3010_v34  ;;  %1174 = vmatpush.msra.mxu1 %v2905_v39  ;;  %v1475_v54 = vadd.f32 %v1474_v48, %v1473_v41  ;;  %v1481_v55 = vrot.slane %v1480_v52, 4  ;;  %v1487_v58 = vsel %vm213_vm0, %v1449_v45, 0.0  ;;  %s2693_s22 = sshra.s32 %s2562_s20, 4  ;;  %s2694_s22 = int_to_ptr.hbm [resolvable:$true] %s2693_s22 }
  0x57   : > { %v1104_v53 = vmul.f32 0.125, %v1096_v42  ;;  %v1469_v26 = vrot.slane %v1468_v47, 2  ;;  %1221 = vmatpush.msra.mxu3 %v2823_v2  ;;  %1199 = vmatpush.msra.mxu2 %v2836_v7  ;;  %v1456_v56 = vadd.f32 %v1455_v50, %v1454_v36  ;;  %v1494_v59 = vsel %vm213_vm0, %v1450_v46, 0.0  ;;  %s2695_s23 = scalar_lea.hbm %s2694_s22, 16  ;;  %p2700_p0 = scmp.lt.s32.totalorder %s2694_s22, %s3297_s4 }
  0x58   : > { %v1463_v57 = vadd.f32 %v1462_v51, %v1461_v40  ;;  %v1476_v63 = vrot.slane %v1475_v54, 2  ;;  %v1482_v0 = vadd.f32 %v1481_v55, %v1480_v52  ;;  %v1488_v14 = vrot.slane %v1487_v58, 4  ;;  %p2696_p11 = scmp.ne.s32.totalorder %s2694_s22, %s2695_s23  ;;  %p2701_p1 = scmp.lt.s32.totalorder %s2699_s29, %s2695_s23 }
  0x59   : > { %v1119_v60 = vsel %vm298_vm7, %v1104_v53, %v1118_v49  ;;  %v1470_v61 = vadd.f32 %v1469_v26, %v1468_v47  ;;  %1223 = vmatpush.msra.mxu3 %v2825_v3  ;;  %v1457_v4 = vrot.slane %v1456_v56, 1  ;;  %v1495_v27 = vrot.slane %v1494_v59, 4 }
  0x5a   : > { %v1120_v1 = vsel %vm213_vm0, %v1119_v60, 0  ;;  %v1464_v8 = vrot.slane %v1463_v57, 1  ;;  %843 = vmatmul.f32.vlgmr.msra.gmra.mxu0 %v3010_v34  ;;  %975 = vmatmul.f32.vlgmr.msrb.gmra.mxu1 %v3023_v29  ;;  %v1477_v21 = vadd.f32 %v1476_v63, %v1475_v54  ;;  %v1483_v22 = vrot.slane %v1482_v0, 2  ;;  %p2697_p12 = pnand %p2696_p11, %p2806_p5  ;;  %p2702_p2 = por %p2701_p1, %p2700_p0 }
  0x5b   : > { %v3068_v37 = vand.u32 4294901760, %v1120_v1  ;;  %v1471_v16 = vrot.slane %v1470_v61, 1  ;;  %1137 = vmatpush.msra.mxu0 %v2823_v2  ;;  %1273 = vmatpush.msrb.mxu1 %v2823_v2  ;;  %v1458_v23 = vadd.f32 %v1457_v4, %v1456_v56  ;;  %v1489_v25 = vadd.f32 %v1488_v14, %v1487_v58 }
  0x5c   : > { %v1465_v24 = vadd.f32 %v1464_v8, %v1463_v57  ;;  %1002 = vmatmul.f32.vlgmr.msrb.gmra.mxu2 %v3010_v34  ;;  %v1478_v30 = vrot.slane %v1477_v21, 1  ;;  %v1484_v31 = vadd.f32 %v1483_v22, %v1482_v0  ;;  %v1496_v33 = vadd.f32 %v1495_v27, %v1494_v59  ;;  %p2698_p13 = pneg %p2697_p12 }
  0x5d   : > { %v3075_v28 = vsub.f32 %v1120_v1, %v3068_v37  ;;  %v1472_v29 = vadd.f32 %v1471_v16, %v1470_v61  ;;  %1139 = vmatpush.msra.mxu0 %v2825_v3  ;;  %1296 = vmatpush.msrb.mxu2 %v2830_v5  ;;  %v1490_v32 = vrot.slane %v1489_v25, 2  ;;  %v1501_v20 = vsel %vm213_vm0, %v1451_v15, 0.0 }
  0x5e   : > { %v1508_v35 = vmul.f32 0.125, %v1458_v23  ;;  %1025 = vmatmul.f32.vlgmr.msrb.gmra.mxu3 %v3010_v34  ;;  %1275 = vmatpush.msrb.mxu1 %v2825_v3  ;;  %v1479_v40 = vadd.f32 %v1478_v30, %v1477_v21  ;;  %v1485_v41 = vrot.slane %v1484_v31, 1  ;;  %v1502_v42 = vrot.slane %v1501_v20, 4  ;;  %p2703_p3 = pnand %p2702_p2, %p2698_p13 }
  0x5f   : > { %v3082_v36 = vand.u32 4294901760, %v3075_v28  ;;  %1327 = vmatpush.msrb.mxu3 %v2915_v17  ;;  %1298 = vmatpush.msrb.mxu2 %v2846_v10  ;;  %v1491_v43 = vadd.f32 %v1490_v32, %v1489_v25  ;;  %v1497_v45 = vrot.slane %v1496_v33, 2  ;;  %v1509_v46 = vmul.f32 0.125, %v1465_v24 }
  0x60   : > { %v1510_v47 = vmul.f32 0.125, %v1472_v29  ;;  %v1486_v48 = vadd.f32 %v1485_v41, %v1484_v31  ;;  %v1503_v49 = vadd.f32 %v1502_v42, %v1501_v20  ;;  %v1511_v50 = vmul.f32 0.125, %v1479_v40 }
  0x61   : > { %1333 = vmatpush.msrb.mxu3 %v2935_v62  ;;  %v1492_v34 = vrot.slane %v1491_v43, 1  ;;  %v1498_v51 = vadd.f32 %v1497_v45, %v1496_v33  ;;  %v1524_v52 = vsel %vm286_vm1, %v1509_v46, %v1508_v35  ;;  %v1143_v53 = vsub.f32 %v3075_v28, %v3082_v36 }
  0x62   : > { %950 = vmatmul.f32.vlgmr.msrb.gmra.mxu0 %v3016_v44  ;;  %1176 = vmatmul.f32.vlgmr.msra.gmra.mxu1 %v3068_v37  ;;  %v1504_v26 = vrot.slane %v1503_v49, 2  ;;  %v1512_v54 = vmul.f32 0.125, %v1486_v48  ;;  %v1525_v55 = vsel %vm288_vm2, %v1510_v47, %v1524_v52 }
  0x63   : > { %1248 = vmatpush.msrb.mxu0 %v2850_v11  ;;  %1380 = vmatpush.msra.mxu1 %v2830_v5  ;;  %v1493_v56 = vadd.f32 %v1492_v34, %v1491_v43  ;;  %v1499_v57 = vrot.slane %v1498_v51, 1  ;;  %v1526_v58 = vsel %vm290_vm3, %v1511_v50, %v1525_v55  ;;  %v1144_v63 = vand.u32 4294901760, %v1143_v53 }
  0x64   : > { %1202 = vmatmul.f32.vlgmr.msra.gmra.mxu2 %v3075_v28  ;;  %v1505_v44 = vadd.f32 %v1504_v26, %v1503_v49  ;;  %v1527_v59 = vsel %vm292_vm4, %v1512_v54, %v1526_v58 }
  0x65   : > { %1252 = vmatpush.msrb.mxu0 %v2854_v12  ;;  %1407 = vmatpush.msra.mxu2 %v2863_v13  ;;  %v1500_v60 = vadd.f32 %v1499_v57, %v1498_v51  ;;  %v1513_v61 = vmul.f32 0.125, %v1493_v56 }
  0x66   : > { %1227 = vmatmul.f32.vlgmr.msra.gmra.mxu3 %v3082_v36  ;;  %1382 = vmatpush.msra.mxu1 %v2846_v10  ;;  %v1506_v0 = vrot.slane %v1505_v44, 1 }
  0x67   : > { %1432 = vmatpush.msra.mxu3 %v2830_v5  ;;  %1411 = vmatpush.msra.mxu2 %v2918_v18  ;;  %v1514_v1 = vmul.f32 0.125, %v1500_v60  ;;  %v1528_v4 = vsel %vm294_vm5, %v1513_v61, %v1527_v59 }
  0x68   : > { %v1507_v8 = vadd.f32 %v1506_v0, %v1505_v44 }
  0x69   : > { %1434 = vmatpush.msra.mxu3 %v2846_v10  ;;  %v1529_v14 = vsel %vm296_vm6, %v1514_v1, %v1528_v4 }
  0x6a   : > { %1145 = vmatmul.f32.vlgmr.msra.gmra.mxu0 %v1144_v63  ;;  %1277 = vmatmul.f32.vlgmr.msrb.gmra.mxu1 %v3068_v37  ;;  %v1515_v15 = vmul.f32 0.125, %v1507_v8 }
  0x6b   : > { %1355 = vmatpush.msra.mxu0 %v2844_v9  ;;  %1579 = vmatpush.msrb.mxu1 %v2900_v38 }
  0x6c   : > { %1304 = vmatmul.f32.vlgmr.msrb.gmra.mxu2 %v1144_v63  ;;  %v1530_v16 = vsel %vm298_vm7, %v1515_v15, %v1529_v14 }
  0x6d   : > { %1358 = vmatpush.msra.mxu0 %v2875_v19  ;;  %1607 = vmatpush.msrb.mxu2 %v2833_v6  ;;  %v1531_v21 = vsel %vm213_vm0, %v1530_v16, 0 }
  0x6e   : > { %1335 = vmatmul.f32.vlgmr.msrb.gmra.mxu3 %v3068_v37  ;;  %v1551_v22 = vand.u32 4294901760, %v1531_v21  ;;  %1585 = vmatpush.msrb.mxu1 %v2905_v39 }
  0x6f   : > { %1632 = vmatpush.msrb.mxu3 %v2823_v2  ;;  %1610 = vmatpush.msrb.mxu2 %v2836_v7 }
  0x70   : > { %v1552_v38 = vsub.f32 %v1531_v21, %v1551_v22 }
  0x71   : > { %1634 = vmatpush.msrb.mxu3 %v2825_v3 }
  0x72   : > { %1254 = vmatmul.f32.vlgmr.msrb.gmra.mxu0 %v3068_v37  ;;  %1386 = vmatmul.f32.vlgmr.msra.gmra.mxu1 %v3082_v36  ;;  %v1553_v6 = vand.u32 4294901760, %v1552_v38 }
  0x73   : > { %1548 = vmatpush.msrb.mxu0 %v2823_v2  ;;  %1684 = vmatpush.msra.mxu1 %v2823_v2 }
  0x74   : > { %1413 = vmatmul.f32.vlgmr.msra.gmra.mxu2 %v3068_v37  ;;  %v1554_v2 = vsub.f32 %v1552_v38, %v1553_v6 }
  0x75   : > { %1550 = vmatpush.msrb.mxu0 %v2825_v3  ;;  %1707 = vmatpush.msra.mxu2 %v2830_v5 }
  0x76   : > { %1436 = vmatmul.f32.vlgmr.msra.gmra.mxu3 %v3068_v37  ;;  %1686 = vmatpush.msra.mxu1 %v2825_v3  ;;  %v1555_v3 = vand.u32 4294901760, %v1554_v2 }
  0x77   : > { %1738 = vmatpush.msra.mxu3 %v2915_v17  ;;  %1709 = vmatpush.msra.mxu2 %v2846_v10 }
  0x79   : > { %1744 = vmatpush.msra.mxu3 %v2935_v62 }
  0x7a   : > { %1361 = vmatmul.f32.vlgmr.msra.gmra.mxu0 %v3075_v28  ;;  %1587 = vmatmul.f32.vlgmr.msrb.gmra.mxu1 %v1551_v22 }
  0x7b   : > { %1659 = vmatpush.msra.mxu0 %v2850_v11  ;;  %1791 = vmatpush.msrb.mxu1 %v2830_v5 }
  0x7c   : > { %1613 = vmatmul.f32.vlgmr.msrb.gmra.mxu2 %v1552_v38 }
  0x7d   : > { %1663 = vmatpush.msra.mxu0 %v2854_v12  ;;  %1818 = vmatpush.msrb.mxu2 %v2863_v13 }
  0x7e   : > { %1638 = vmatmul.f32.vlgmr.msrb.gmra.mxu3 %v1553_v6  ;;  %1793 = vmatpush.msrb.mxu1 %v2846_v10 }
  0x7f   : > { %1843 = vmatpush.msrb.mxu3 %v2830_v5  ;;  %1822 = vmatpush.msrb.mxu2 %v2918_v18 }
  0x81   : > { %1845 = vmatpush.msrb.mxu3 %v2846_v10 }
  0x82   : > { %1556 = vmatmul.f32.vlgmr.msrb.gmra.mxu0 %v1555_v3  ;;  %1688 = vmatmul.f32.vlgmr.msra.gmra.mxu1 %v1551_v22 }
  0x83   : > { %1766 = vmatpush.msrb.mxu0 %v2844_v9 }
  0x84   : > { %1715 = vmatmul.f32.vlgmr.msra.gmra.mxu2 %v1555_v3 }
  0x85   : > { %1769 = vmatpush.msrb.mxu0 %v2875_v19 }
  0x86   : > { %1746 = vmatmul.f32.vlgmr.msra.gmra.mxu3 %v1551_v22 }
  0x8a   : > { %1665 = vmatmul.f32.vlgmr.msra.gmra.mxu0 %v1551_v22  ;;  %1797 = vmatmul.f32.vlgmr.msrb.gmra.mxu1 %v1553_v6 }
  0x8c   : > { %1824 = vmatmul.f32.vlgmr.msrb.gmra.mxu2 %v1551_v22 }
  0x8e   : > { %1847 = vmatmul.f32.vlgmr.msrb.gmra.mxu3 %v1551_v22 }
  0x92   : > { %1772 = vmatmul.f32.vlgmr.msrb.gmra.mxu0 %v1552_v38 }
  0xaf   : > { %v357_v7 = vpop.f32.mrf.mxu1 }
  0xb7   : > { %v326_v11 = vpop.f32.mrf.mxu0  ;;  %v383_v5 = vpop.f32.mrf.mxu2 }
  0xb8   : > { %v358_v12 = vadd.f32 %v357_v7, %v326_v11  ;;  %v458_v13 = vpop.f32.mrf.mxu1 }
  0xb9   : > { %v408_v39 = vpop.f32.mrf.mxu3 }
  0xba   : > { %v384_v10 = vadd.f32 %v383_v5, %v358_v12 }
  0xbc   : > { %v409_v17 = vadd.f32 %v408_v39, %v384_v10 }
  0xbf   : > { %v435_v18 = vpop.f32.mrf.mxu0  ;;  %v485_v62 = vpop.f32.mrf.mxu2 }
  0xc0   : > { %v436_v9 = vadd.f32 %v435_v18, %v409_v17  ;;  %v567_v37 = vpop.f32.mrf.mxu1 }
  0xc1   : > { %v516_v23 = vpop.f32.mrf.mxu3 }
  0xc2   : > { %v3143_v19 = vadd.f32 %v458_v13, %v436_v9  ;;  %v517_v24 = vadd.f32 %v516_v23, %v485_v62 }
  0xc7   : > { %v542_v25 = vpop.f32.mrf.mxu0  ;;  %v594_v27 = vpop.f32.mrf.mxu2 }
  0xc8   : > { %v543_v28 = vadd.f32 %v542_v25, %v517_v24  ;;  %v766_v29 = vpop.f32.mrf.mxu1 }
  0xc9   : > { %v617_v30 = vpop.f32.mrf.mxu3 }
  0xca   : > { %v568_v31 = vadd.f32 %v567_v37, %v543_v28 }
  0xcc   : > { %v595_v32 = vadd.f32 %v594_v27, %v568_v31 }
  0xce   : > { %v3145_v33 = vadd.f32 %v617_v30, %v595_v32 }
  0xcf   : > { %v735_v20 = vpop.f32.mrf.mxu0  ;;  %v792_v35 = vpop.f32.mrf.mxu2 }
  0xd0   : > { %v867_v36 = vpop.f32.mrf.mxu1  ;;  %v767_v59 = vadd.f32 %v766_v29, %v735_v20  ;;  %v620_v20 = vmul.f32 %v3143_v19, %v3143_v19 }
  0xd1   : > { %v817_v40 = vpop.f32.mrf.mxu3 }
  0xd2   : > { %v793_v4 = vadd.f32 %v792_v35, %v767_v59 }
  0xd4   : > { %v818_v38 = vadd.f32 %v817_v40, %v793_v4 }
  0xd7   : > { %v844_v41 = vpop.f32.mrf.mxu0  ;;  %v894_v42 = vpop.f32.mrf.mxu2 }
  0xd8   : > { %v976_v43 = vpop.f32.mrf.mxu1  ;;  %v845_v11 = vadd.f32 %v844_v41, %v818_v38 }
  0xd9   : > { %v925_v45 = vpop.f32.mrf.mxu3 }
  0xda   : > { %v926_v63 = vadd.f32 %v925_v45, %v894_v42  ;;  %v868_v18 = vadd.f32 %v867_v36, %v845_v11  ;;  %v621_v36 = vmul.f32 %v3145_v33, %v3145_v33  ;;  %v1872_v33 = vld [vmem:[%s3295_s2 + $0x10] sm:$0xff]  ;;  %v1862_v11 = vld [vmem:[%s3296_s3] sm:$0x3] }
  0xdc   : > { %v1029_v28 = vmul.f32 %v868_v18, %v868_v18 }
  0xdf   : > { %v951_v46 = vpop.f32.mrf.mxu0  ;;  %v1003_v47 = vpop.f32.mrf.mxu2 }
  0xe0   : > { %v1177_v48 = vpop.f32.mrf.mxu1  ;;  %v952_v8 = vadd.f32 %v951_v46, %v926_v63 }
  0xe1   : > { %v1026_v49 = vpop.f32.mrf.mxu3 }
  0xe2   : > { %v977_v6 = vadd.f32 %v976_v43, %v952_v8  ;;  %v1031_v43 = vadd.f32 %v1029_v28, %v620_v20 }
  0xe4   : > { %v1004_v13 = vadd.f32 %v1003_v47, %v977_v6 }
  0xe6   : > { %v1027_v37 = vadd.f32 %v1026_v49, %v1004_v13 }
  0xe7   : > { %v1146_v50 = vpop.f32.mrf.mxu0  ;;  %v1203_v34 = vpop.f32.mrf.mxu2 }
  0xe8   : > { %v1278_v52 = vpop.f32.mrf.mxu1  ;;  %v1178_v0 = vadd.f32 %v1177_v48, %v1146_v50  ;;  %v1030_v35 = vmul.f32 %v1027_v37, %v1027_v37 }
  0xe9   : > { %v1228_v51 = vpop.f32.mrf.mxu3 }
  0xea   : > { %v1204_v16 = vadd.f32 %v1203_v34, %v1178_v0  ;;  %v1032_v48 = vadd.f32 %v1030_v35, %v621_v36 }
  0xec   : > { %v1229_v5 = vadd.f32 %v1228_v51, %v1204_v16 }
  0xef   : > { %v1255_v53 = vpop.f32.mrf.mxu0  ;;  %v1305_v26 = vpop.f32.mrf.mxu2 }
  0xf0   : > { %v1387_v55 = vpop.f32.mrf.mxu1  ;;  %v1256_v39 = vadd.f32 %v1255_v53, %v1229_v5  ;;  %v1864_v5 = vperm.slane %v1862_v11, 0 }
  0xf1   : > { %v1336_v54 = vpop.f32.mrf.mxu3 }
  0xf2   : > { %v1337_v14 = vadd.f32 %v1336_v54, %v1305_v26  ;;  %v1279_v23 = vadd.f32 %v1278_v52, %v1256_v39 }
  0xf4   : > { %v1440_v40 = vmul.f32 %v1279_v23, %v1279_v23 }
  0xf6   : > { %v1442_v49 = vadd.f32 %v1440_v40, %v1031_v43 }
  0xf7   : > { %v1362_v56 = vpop.f32.mrf.mxu0  ;;  %v1414_v57 = vpop.f32.mrf.mxu2 }
  0xf8   : > { %v1588_v44 = vpop.f32.mrf.mxu1  ;;  %v1363_v21 = vadd.f32 %v1362_v56, %v1337_v14 }
  0xf9   : > { %v1437_v58 = vpop.f32.mrf.mxu3 }
  0xfa   : > { %v1388_v12 = vadd.f32 %v1387_v55, %v1363_v21  ;;  %v3154_v55 = vand.u32 4294901760, %v1872_v33 }
  0xfc   : > { %v1415_v62 = vadd.f32 %v1414_v57, %v1388_v12  ;;  %v3157_v56 = vsub.f32 %v1872_v33, %v3154_v55  ;;  %1973 = vmatpush.xpose.msra.mxu3 %v3154_v55  ;;  %1889 = vmatpush.xpose.msra.mxu0 %v3154_v55  ;;  %v1870_v57 = vld [vmem:[%s3295_s2] sm:$0xff]  ;;  %v1865_v12 = vperm.slane %v1862_v11, 1 }
  0xfe   : > { %v1438_v29 = vadd.f32 %v1437_v58, %v1415_v62  ;;  %v3165_v58 = vand.u32 4294901760, %v3157_v56  ;;  %1948 = vmatpush.xpose.msra.mxu2 %v3157_v56 }
  0xff   : > { %v1557_v60 = vpop.f32.mrf.mxu0  ;;  %v1614_v61 = vpop.f32.mrf.mxu2 }
 0x100   : > { %v1589_v15 = vadd.f32 %v1588_v44, %v1557_v60  ;;  %v1689_v22 = vpop.f32.mrf.mxu1  ;;  %v1441_v45 = vmul.f32 %v1438_v29, %v1438_v29  ;;  %v3168_v44 = vand.u32 4294901760, %v1870_v57  ;;  %v1918_v59 = vsub.f32 %v3157_v56, %v3165_v58 }
 0x101   : > { %v1639_v1 = vpop.f32.mrf.mxu3 }
 0x102   : > { %v1615_v2 = vadd.f32 %v1614_v61, %v1589_v15  ;;  %v1443_v34 = vadd.f32 %v1441_v45, %v1032_v48  ;;  %v3173_v60 = vsub.f32 %v1870_v57, %v3168_v44  ;;  %1975 = vmatpush.xpose.msra.mxu3 %v3168_v44  ;;  %1891 = vmatpush.xpose.msra.mxu0 %v3168_v44  ;;  %v1919_v61 = vand.u32 4294901760, %v1918_v59  ;;  %v1871_v15 = vld [vmem:[%s3295_s2 + $0x8] sm:$0xff] }
 0x103   : > { %v3201_v21 = vand.u32 4294901760, %v1871_v15 }
 0x104   : > { %v1640_v10 = vadd.f32 %v1639_v1, %v1615_v2  ;;  %v3179_v63 = vand.u32 4294901760, %v3173_v60  ;;  %1951 = vmatpush.xpose.msra.mxu2 %v3173_v60  ;;  %1920 = vmatpush.xpose.msra.mxu1 %v1919_v61  ;;  %v1873_v1 = vld [vmem:[%s3295_s2 + $0x18] sm:$0xff] }
 0x105   : > { %v3188_v8 = vand.u32 4294901760, %v1873_v1  ;;  %v3207_v38 = vsub.f32 %v1871_v15, %v3201_v21 }
 0x106   : > { %2000 = vmatpush.xpose.msrb.mxu0 %v3165_v58  ;;  %v1924_v0 = vsub.f32 %v3173_v60, %v3179_v63 }
 0x107   : > { %v1666_v3 = vpop.f32.mrf.mxu0  ;;  %v1716_v7 = vpop.f32.mrf.mxu2  ;;  %v3192_v14 = vsub.f32 %v1873_v1, %v3188_v8  ;;  %v3211_v2 = vand.u32 4294901760, %v3207_v38 }
 0x108   : > { %v1667_v9 = vadd.f32 %v1666_v3, %v1640_v10  ;;  %v1798_v27 = vpop.f32.mrf.mxu1  ;;  %v1925_v4 = vand.u32 4294901760, %v1924_v0  ;;  %2048 = vmatpush.xpose.msrb.mxu2 %v3188_v8 }
 0x109   : > { %v1747_v17 = vpop.f32.mrf.mxu3  ;;  %v3199_v16 = vand.u32 4294901760, %v3192_v14  ;;  %v2083_v3 = vsub.f32 %v3207_v38, %v3211_v2 }
 0x10a   : > { %v1748_v24 = vadd.f32 %v1747_v17, %v1716_v7  ;;  %v1690_v30 = vadd.f32 %v1689_v22, %v1667_v9  ;;  %2004 = vmatpush.xpose.msrb.mxu0 %v3179_v63  ;;  %1926 = vmatpush.xpose.msra.mxu1 %v1925_v4 }
 0x10b   : > { %v2077_v22 = vsub.f32 %v3192_v14, %v3199_v16  ;;  %v2084_v7 = vand.u32 4294901760, %v2083_v3 }
 0x10c   : > { %v1851_v46 = vmul.f32 %v1690_v30, %v1690_v30  ;;  %2050 = vmatpush.xpose.msrb.mxu2 %v3201_v21 }
 0x10d   : > { %v2078_v6 = vand.u32 4294901760, %v2077_v22 }
 0x10e   : > { %v1853_v52 = vadd.f32 %v1851_v46, %v1442_v49  ;;  %2025 = vmatpush.xpose.msrb.mxu1 %v3154_v55 }
 0x10f   : > { %v1773_v25 = vpop.f32.mrf.mxu0  ;;  %v1825_v32 = vpop.f32.mrf.mxu2  ;;  %2079 = vmatpush.xpose.msrb.mxu3 %v2078_v6 }
 0x110   : > { %v1774_v31 = vadd.f32 %v1773_v25, %v1748_v24  ;;  %v1855_v26 = vmax.f32 %v1853_v52, 0.0 }
 0x111   : > { %v1848_v42 = vpop.f32.mrf.mxu3 }
 0x112   : > { %v1799_v41 = vadd.f32 %v1798_v27, %v1774_v31  ;;  %2027 = vmatpush.xpose.msrb.mxu1 %v3168_v44 }
 0x113   : > { %2085 = vmatpush.xpose.msrb.mxu3 %v2084_v7 }
 0x114   : > { %v1826_v47 = vadd.f32 %v1825_v32, %v1799_v41 }
 0x116   : > { %v1849_v50 = vadd.f32 %v1848_v42, %v1826_v47 }
 0x118   : > { %v1852_v51 = vmul.f32 %v1849_v50, %v1849_v50 }
 0x11a   : > { %v1854_v53 = vadd.f32 %v1852_v51, %v1443_v34 }
 0x11c   : > { %v1856_v19 = vmax.f32 %v1854_v53, 0.0 }
 0x11e   : > { %v1857_v54 = vmax.f32 %v1855_v26, %v1856_v19 }
 0x120   : > { %1858 = vmax.xlane.f32.xlu0 %v1857_v54 }
 0x193   : > { %v1859_v13 = vpop.xlane.xlu0 %1858 }
 0x194   : > { %v1860_v39 = vsub.f32 %v1859_v13, %v1855_v26  ;;  %v1861_v10 = vsub.f32 %v1859_v13, %v1856_v19 }
 0x196   : > { %v3218_v17 = vmul.f32 %v1864_v5, %v1860_v39  ;;  %v3220_v18 = vmul.f32 %v1865_v12, %v1861_v10 }
 0x198   : > { %v1892_v62 = vand.u32 4294901760, %v3218_v17  ;;  %v2051_v9 = vand.u32 4294901760, %v3220_v18 }
 0x19a   : > { %v1893_v37 = vsub.f32 %v3218_v17, %v1892_v62  ;;  %v2052_v23 = vsub.f32 %v3220_v18, %v2051_v9  ;;  %1928 = vmatmul.f32.vlgmr.msra.gmra.mxu1 %v1892_v62 }
 0x19b   : > { %2132 = vmatpush.xpose.msra.mxu1 %v3188_v8 }
 0x19c   : > { %1954 = vmatmul.f32.vlgmr.msra.gmra.mxu2 %v1893_v37  ;;  %v1894_v24 = vand.u32 4294901760, %v1893_v37  ;;  %v2053_v25 = vand.u32 4294901760, %v2052_v23 }
 0x19d   : > { %2159 = vmatpush.xpose.msra.mxu2 %v3199_v16 }
 0x19e   : > { %1979 = vmatmul.f32.vlgmr.msra.gmra.mxu3 %v1894_v24  ;;  %v1895_v27 = vsub.f32 %v1893_v37, %v1894_v24  ;;  %v2054_v28 = vsub.f32 %v2052_v23, %v2053_v25 }
 0x19f   : > { %2134 = vmatpush.xpose.msra.mxu1 %v3201_v21  ;;  %2184 = vmatpush.xpose.msra.mxu3 %v3188_v8 }
 0x1a0   : > { %v1896_v29 = vand.u32 4294901760, %v1895_v27  ;;  %v2055_v30 = vand.u32 4294901760, %v2054_v28 }
 0x1a1   : > { %2163 = vmatpush.xpose.msra.mxu2 %v3211_v2 }
 0x1a2   : > { %1897 = vmatmul.f32.vlgmr.msra.gmra.mxu0 %v1896_v29  ;;  %2029 = vmatmul.f32.vlgmr.msrb.gmra.mxu1 %v1892_v62 }
 0x1a3   : > { %2107 = vmatpush.xpose.msra.mxu0 %v3192_v14  ;;  %2186 = vmatpush.xpose.msra.mxu3 %v3201_v21 }
 0x1a4   : > { %2056 = vmatmul.f32.vlgmr.msrb.gmra.mxu2 %v2055_v30  ;;  %2241 = vmatpush.msrb.mxu1 %v1919_v61 }
 0x1a5   : > { %2269 = vmatpush.msrb.mxu2 %v3157_v56 }
 0x1a6   : > { %2087 = vmatmul.f32.vlgmr.msrb.gmra.mxu3 %v2051_v9  ;;  %2247 = vmatpush.msrb.mxu1 %v1925_v4 }
 0x1a7   : > { %2110 = vmatpush.xpose.msra.mxu0 %v3207_v38  ;;  %2294 = vmatpush.msrb.mxu3 %v3154_v55 }
 0x1a8   : > { %2272 = vmatpush.msrb.mxu2 %v3173_v60 }
 0x1a9   : > { %2296 = vmatpush.msrb.mxu3 %v3168_v44 }
 0x1aa   : > { %2006 = vmatmul.f32.vlgmr.msrb.gmra.mxu0 %v1892_v62  ;;  %2138 = vmatmul.f32.vlgmr.msra.gmra.mxu1 %v2053_v25 }
 0x1ab   : > { %2210 = vmatpush.msrb.mxu0 %v3154_v55  ;;  %2346 = vmatpush.msra.mxu1 %v3154_v55 }
 0x1ac   : > { %2165 = vmatmul.f32.vlgmr.msra.gmra.mxu2 %v2051_v9 }
 0x1ad   : > { %2212 = vmatpush.msrb.mxu0 %v3168_v44  ;;  %2369 = vmatpush.msra.mxu2 %v3188_v8 }
 0x1ae   : > { %2188 = vmatmul.f32.vlgmr.msra.gmra.mxu3 %v2051_v9  ;;  %2348 = vmatpush.msra.mxu1 %v3168_v44 }
 0x1af   : > { %2400 = vmatpush.msra.mxu3 %v2078_v6  ;;  %2371 = vmatpush.msra.mxu2 %v3201_v21 }
 0x1b1   : > { %2406 = vmatpush.msra.mxu3 %v2084_v7 }
 0x1b2   : > { %2113 = vmatmul.f32.vlgmr.msra.gmra.mxu0 %v2052_v23 }
 0x1b3   : > { %2321 = vmatpush.msra.mxu0 %v3165_v58 }
 0x1b5   : > { %2325 = vmatpush.msra.mxu0 %v3179_v63 }
 0x217   : > { %v1929_v31 = vpop.f32.mrf.mxu1 }
 0x21f   : > { %v1898_v32 = vpop.f32.mrf.mxu0  ;;  %v1955_v20 = vpop.f32.mrf.mxu2 }
 0x220   : > { %v1930_v35 = vadd.f32 %v1929_v31, %v1898_v32  ;;  %v2030_v42 = vpop.f32.mrf.mxu1 }
 0x221   : > { %v1980_v40 = vpop.f32.mrf.mxu3 }
 0x222   : > { %v1956_v41 = vadd.f32 %v1955_v20, %v1930_v35 }
 0x224   : > { %v1981_v36 = vadd.f32 %v1980_v40, %v1956_v41 }
 0x227   : > { %v2007_v43 = vpop.f32.mrf.mxu0  ;;  %v2057_v46 = vpop.f32.mrf.mxu2 }
 0x228   : > { %v2008_v45 = vadd.f32 %v2007_v43, %v1981_v36  ;;  %v2139_v52 = vpop.f32.mrf.mxu1 }
 0x229   : > { %v2088_v48 = vpop.f32.mrf.mxu3 }
 0x22a   : > { %v2031_v47 = vadd.f32 %v2030_v42, %v2008_v45 }
 0x22c   : > { %v2058_v49 = vadd.f32 %v2057_v46, %v2031_v47 }
 0x22e   : > { %v2089_v50 = vadd.f32 %v2088_v48, %v2058_v49 }
 0x22f   : > { %v2114_v34 = vpop.f32.mrf.mxu0  ;;  %v2166_v26 = vpop.f32.mrf.mxu2 }
 0x230   : > { %v2115_v51 = vadd.f32 %v2114_v34, %v2089_v50 }
 0x231   : > { %v2189_v54 = vpop.f32.mrf.mxu3 }
 0x232   : > { %v2140_v53 = vadd.f32 %v2139_v52, %v2115_v51 }
 0x234   : > { %v2167_v19 = vadd.f32 %v2166_v26, %v2140_v53 }
 0x236   : > { %v2190_v33 = vadd.f32 %v2189_v54, %v2167_v19 }
 0x238   : > { %v2193_v55 = vsel %vm213_vm0, %v2190_v33, 0 }
 0x239   : > { %v2213_v56 = vand.u32 4294901760, %v2193_v55 }
 0x23b   : > { %v2214_v57 = vsub.f32 %v2193_v55, %v2213_v56  ;;  %2249 = vmatmul.f32.vlgmr.msrb.gmra.mxu1 %v2213_v56 }
 0x23c   : > { %2453 = vmatpush.msrb.mxu1 %v3188_v8 }
 0x23d   : > { %2275 = vmatmul.f32.vlgmr.msrb.gmra.mxu2 %v2214_v57  ;;  %v2215_v58 = vand.u32 4294901760, %v2214_v57 }
 0x23e   : > { %2480 = vmatpush.msrb.mxu2 %v3199_v16  ;;  %2455 = vmatpush.msrb.mxu1 %v3201_v21 }
 0x23f   : > { %2300 = vmatmul.f32.vlgmr.msrb.gmra.mxu3 %v2215_v58  ;;  %v2216_v44 = vsub.f32 %v2214_v57, %v2215_v58 }
 0x240   : > { %2505 = vmatpush.msrb.mxu3 %v3188_v8  ;;  %2484 = vmatpush.msrb.mxu2 %v3211_v2 }
 0x241   : > { %v2217_v59 = vand.u32 4294901760, %v2216_v44 }
 0x242   : > { %2507 = vmatpush.msrb.mxu3 %v3201_v21 }
 0x243   : > { %2218 = vmatmul.f32.vlgmr.msrb.gmra.mxu0 %v2217_v59  ;;  %2350 = vmatmul.f32.vlgmr.msra.gmra.mxu1 %v2213_v56 }
 0x244   : > { %2428 = vmatpush.msrb.mxu0 %v3192_v14 }
 0x245   : > { %2377 = vmatmul.f32.vlgmr.msra.gmra.mxu2 %v2217_v59 }
 0x246   : > { %2431 = vmatpush.msrb.mxu0 %v3207_v38 }
 0x247   : > { %2408 = vmatmul.f32.vlgmr.msra.gmra.mxu3 %v2213_v56 }
 0x24b   : > { %2327 = vmatmul.f32.vlgmr.msra.gmra.mxu0 %v2213_v56  ;;  %2459 = vmatmul.f32.vlgmr.msrb.gmra.mxu1 %v2215_v58 }
 0x24d   : > { %2486 = vmatmul.f32.vlgmr.msrb.gmra.mxu2 %v2213_v56 }
 0x24f   : > { %2509 = vmatmul.f32.vlgmr.msrb.gmra.mxu3 %v2213_v56 }
 0x253   : > { %2434 = vmatmul.f32.vlgmr.msrb.gmra.mxu0 %v2214_v57 }
 0x2b8   : > { %v2250_v60 = vpop.f32.mrf.mxu1 }
 0x2c0   : > { %v2219_v61 = vpop.f32.mrf.mxu0  ;;  %v2276_v63 = vpop.f32.mrf.mxu2 }
 0x2c1   : > { %v2251_v0 = vadd.f32 %v2250_v60, %v2219_v61  ;;  %v2351_v15 = vpop.f32.mrf.mxu1 }
 0x2c2   : > { %v2301_v1 = vpop.f32.mrf.mxu3 }
 0x2c3   : > { %v2277_v4 = vadd.f32 %v2276_v63, %v2251_v0 }
 0x2c5   : > { %v2302_v8 = vadd.f32 %v2301_v1, %v2277_v4 }
 0x2c8   : > { %v2328_v16 = vpop.f32.mrf.mxu0  ;;  %v2378_v14 = vpop.f32.mrf.mxu2 }
 0x2c9   : > { %v2329_v21 = vadd.f32 %v2328_v16, %v2302_v8  ;;  %v2460_v7 = vpop.f32.mrf.mxu1 }
 0x2ca   : > { %v2409_v38 = vpop.f32.mrf.mxu3 }
 0x2cb   : > { %v2352_v22 = vadd.f32 %v2351_v15, %v2329_v21  ;;  %v2410_v6 = vadd.f32 %v2409_v38, %v2378_v14 }
 0x2cd   : > { %2675 = vrcp.f32 %v2352_v22  ;;  %v2524_v37 = vand.u32 2147483648, %v2352_v22  ;;  %v2522_v24 = vand.u32 2147483647, %v2352_v22  ;;  %vm2518_vm9 = vweird.f32 %v2352_v22 }
 0x2cf   : > { %v2525_v27 = vor.u32 1.1754944e-38, %v2524_v37  ;;  %vm2523_vm11 = vcmp.eq.f32.partialorder %v2522_v24, 8.507059e+37 }
 0x2d0   : > { %v2435_v2 = vpop.f32.mrf.mxu0  ;;  %v2487_v13 = vpop.f32.mrf.mxu2 }
 0x2d1   : > { %v2436_v3 = vadd.f32 %v2435_v2, %v2410_v6 }
 0x2d2   : > { %v2510_v62 = vpop.f32.mrf.mxu3 }
 0x2d3   : > { %v2676_v11 = vpop.eup %2675  ;;  %v2461_v5 = vadd.f32 %v2460_v7, %v2436_v3 }
 0x2d4   : > { %v2514_v12 = vmul.f32 %v2676_v11, %v2352_v22  ;;  %vm2519_vm8 = vweird.f32 %v2676_v11 }
 0x2d5   : > { %v2488_v39 = vadd.f32 %v2487_v13, %v2461_v5  ;;  %vm2520_vm10 = vmor %vm2518_vm9, %vm2519_vm8 }
 0x2d6   : > { %v2515_v10 = vsub.f32 1.0, %v2514_v12 }
 0x2d7   : > { %v2511_v9 = vadd.f32 %v2510_v62, %v2488_v39 }
 0x2d8   : > { %v2516_v23 = vmul.f32 %v2676_v11, %v2515_v10 }
 0x2d9   : > { %2677 = vrcp.f32 %v2511_v9  ;;  %v2538_v35 = vand.u32 2147483648, %v2511_v9  ;;  %v2536_v41 = vand.u32 2147483647, %v2511_v9  ;;  %vm2532_vm13 = vweird.f32 %v2511_v9 }
 0x2da   : > { %v2517_v25 = vadd.f32 %v2676_v11, %v2516_v23 }
 0x2db   : > { %vm2537_vm15 = vcmp.eq.f32.partialorder %v2536_v41, 8.507059e+37 }
 0x2dc   : > { %v2521_v28 = vsel %vm2520_vm10, %v2676_v11, %v2517_v25 }
 0x2dd   : > { %v2526_v29 = vsel %vm2523_vm11, %v2525_v27, %v2521_v28 }
 0x2de   : > { %v2541_v30 = vmul.f32 %v2526_v29, %v3218_v17  ;;  %v2539_v17 = vor.u32 1.1754944e-38, %v2538_v35 }
 0x2df   : > { %v2678_v31 = vpop.eup %2677 }
 0x2e0   : > { %v2528_v32 = vmul.f32 %v2678_v31, %v2511_v9  ;;  %2543 = vst [vmem:[%s193_s9] sm:$0xff] %v2541_v30  ;;  %vm2533_vm12 = vweird.f32 %v2678_v31 }
 0x2e1   : > { %vm2534_vm14 = vmor %vm2532_vm13, %vm2533_vm12 }
 0x2e2   : > { %v2529_v20 = vsub.f32 1.0, %v2528_v32 }
 0x2e4   : > { %v2530_v40 = vmul.f32 %v2678_v31, %v2529_v20 }
 0x2e6   : > { %v2531_v36 = vadd.f32 %v2678_v31, %v2530_v40 }
 0x2e8   : > { %v2535_v42 = vsel %vm2534_vm14, %v2678_v31, %v2531_v36 }
 0x2e9   : > { %v2540_v43 = vsel %vm2537_vm15, %v2539_v17, %v2535_v42 }
 0x2ea   : > { %v2542_v45 = vmul.f32 %v2540_v43, %v3220_v18 }
 0x2ec   : > { %2544 = vst [vmem:[%s193_s9 + $0x8] sm:$0xff] %v2542_v45 }
 0x2ed   : > { %2706 = shalt.err (!%p2703_p3)
}
 0x2ee   : > { %2636 = dma.vmem_to_hbm [thread:$0]  (%p2806_p5), %s2560_s14, 256, %s2562_s20, %s2546_s19  }
 0x2ef PF: > { %p2642_p4 = scmp.ge.s32.totalorder %s2741_s18, 2  ;;  %s2573_s6 = sand.u32 1, %s2729_s15  }
 0x2f0   : > { %s2574_s7 = scalar_lea.sflag [#allocation3], %s2573_s6 }
 0x2f1   : > { %p2639_p7 = pnand %p2642_p4, %p2810_p6 }
 0x2f3   : > { %p2640_p8 = pneg %p2639_p7 }
 0x2f5   : > { %2724 = dma.done.wait (%p2640_p8), %s2574_s7, 256  }
 0x2f6   : > { %2726 = vsyncadd (%p2640_p8), %s2574_s7, 4294967040  ;;  %p14_p9 = scmp.ge.s32.totalorder %s2793_s21, 4   ;;  %s3300_s15 = smov %s2733_s16 }
 0x2f7   : > { %s3301_s16 = smov %s2737_s17  ;;  %s3302_s17 = smov %s2804_s24 }
 0x2f8   : > { %s3303_s18 = smov %s2793_s21  ;;  %16 = sbr.rel (!%p14_p9) target bundleno = 3 (0x3), region = 71 }
 0x2fd   :  { %2580 = vsyncpa [#allocation3], 1 }
 0x2fe   :  { %2582 = vsyncpa [#allocation3 + $0x1], 1 }

</bundles_post_ra>
